<compile_context>
chip_gen: v6e
topology: v6e:2x2x1
jax: 0.10.0
libtpu: 0.0.40
codegen_flags: <defaults>
</compile_context>

<pallas_src>
import jax
import jax.numpy as jnp
from jax import lax
from jax.experimental import pallas as pl
from jax.experimental.pallas import tpu as pltpu


def _round_up(x, m):
    return (x + m - 1) // m * m


def _one_act_linear_kernel(x_ref, w_ref, m_ref, b_ref, o_ref, acc_ref):
    # x_ref : (tm, tk)   activation tile
    # w_ref : (tn, tk)   weight tile, native (out, in) layout
    # m_ref : (tn, tk)   weight-mask tile
    # b_ref : (1,  tn)   bias tile
    # o_ref : (tm, tn)   output tile
    # acc_ref: (tm, tn)  f32 accumulator (persists across the K grid axis)
    k = pl.program_id(2)

    @pl.when(k == 0)
    def _():
        acc_ref[...] = jnp.zeros_like(acc_ref)

    # Masked weight tile; contract K (axis 1 of both operands) directly on the
    # MXU -- no transpose copy.
    w_masked = w_ref[...] * m_ref[...]
    acc_ref[...] += lax.dot_general(
        x_ref[...], w_masked,
        dimension_numbers=(((1,), (1,)), ((), ())),
        preferred_element_type=jnp.float32,
    )

    @pl.when(k == pl.num_programs(2) - 1)
    def _():
        o_ref[...] = (acc_ref[...] + b_ref[...]).astype(o_ref.dtype)


@jax.jit
def one_act_linear_forward(x, weight, weight_mask, bias):
    """x: (B, in), weight/weight_mask: (out, in), bias: (out,) -> (B, out)."""
    B, K = x.shape
    N, K2 = weight.shape
    assert K == K2, (K, K2)
    assert weight_mask.shape == weight.shape
    assert bias.shape == (N,)

    # Hardware-aligned tile sizes (clamped for small problems).
    tm = min(128, _round_up(B, 8))      # sublane-aligned
    tn = min(256, _round_up(N, 128))    # lane-dense output stores
    tk = min(256, _round_up(K, 128))    # MXU-aligned reduction tile

    Bp, Np, Kp = _round_up(B, tm), _round_up(N, tn), _round_up(K, tk)

    f32 = jnp.float32
    x_p = jnp.pad(x.astype(f32), ((0, Bp - B), (0, Kp - K)))
    w_p = jnp.pad(weight.astype(f32), ((0, Np - N), (0, Kp - K)))
    m_p = jnp.pad(weight_mask.astype(f32), ((0, Np - N), (0, Kp - K)))
    b_p = jnp.pad(bias.astype(f32), (0, Np - N)).reshape(1, Np)

    grid = (Bp // tm, Np // tn, Kp // tk)

    cost = pl.CostEstimate(
        flops=2 * Bp * Np * Kp + Np * Kp + Bp * Np,
        transcendentals=0,
        bytes_accessed=4 * (Bp * Kp + 2 * Np * Kp + Np + Bp * Np),
    )

    out = pl.pallas_call(
        _one_act_linear_kernel,
        out_shape=jax.ShapeDtypeStruct((Bp, Np), f32),
        grid_spec=pltpu.PrefetchScalarGridSpec(
            num_scalar_prefetch=0,
            grid=grid,
            in_specs=[
                pl.BlockSpec((tm, tk), lambda i, j, k: (i, k)),   # x
                pl.BlockSpec((tn, tk), lambda i, j, k: (j, k)),   # W
                pl.BlockSpec((tn, tk), lambda i, j, k: (j, k)),   # mask
                pl.BlockSpec((1, tn), lambda i, j, k: (0, j)),    # bias
            ],
            out_specs=pl.BlockSpec((tm, tn), lambda i, j, k: (i, j)),
            scratch_shapes=[pltpu.VMEM((tm, tn), f32)],
        ),
        compiler_params=pltpu.CompilerParams(
            dimension_semantics=("parallel", "parallel", "arbitrary"),
            vmem_limit_bytes=32 * 1024 * 1024,
        ),
        cost_estimate=cost,
    )(x_p, w_p, m_p, b_p)

    return out[:B, :N]


def init_one_act_linear_params(key, in_features, out_features):
    """nn.Linear-style init: Kaiming-uniform weight (bound=1/sqrt(fan_in)) and
    uniform(-bound, bound) bias, matching OneActLinear.reset_parameters()."""
    kw, kb = jax.random.split(key)
    bound = 1.0 / (in_features ** 0.5)
    w = jax.random.uniform(kw, (out_features, in_features),
                           minval=-bound, maxval=bound, dtype=jnp.float32)
    b = jax.random.uniform(kb, (out_features,),
                           minval=-bound, maxval=bound, dtype=jnp.float32)
    return w, b


if __name__ == "__main__":
    key = jax.random.PRNGKey(0)
    k_x, k_p, k_m = jax.random.split(key, 3)

    batch = 16
    in_features = 512
    out_features = 256

    x = jax.random.normal(k_x, (batch, in_features), dtype=jnp.float32)
    weight, bias = init_one_act_linear_params(k_p, in_features, out_features)
    weight_mask = jax.random.bernoulli(
        k_m, 0.5, (out_features, in_features)).astype(jnp.float32)

    out = one_act_linear_forward(x, weight, weight_mask, bias)
    out = jax.block_until_ready(out)

    # Reference: torch.matmul(input, W.T * mask.T) + bias
    ref = x @ (weight * weight_mask).T + bias
    assert out.shape == (batch, out_features)
    assert jnp.allclose(out, ref, atol=1e-4, rtol=1e-4), "mismatch vs reference"

    print("KERNEL_OK")
</pallas_src>

<mosaic_0001>
module attributes {stable_mosaic.version = 11 : i64} {
  func.func @_one_act_linear_kernel(%arg0: i32, %arg1: i32, %arg2: i32, %arg3: memref<16x256xf32, #tpu.memory_space<vmem>>, %arg4: memref<256x256xf32, #tpu.memory_space<vmem>>, %arg5: memref<256x256xf32, #tpu.memory_space<vmem>>, %arg6: memref<1x256xf32, #tpu.memory_space<vmem>>, %arg7: memref<16x256xf32, #tpu.memory_space<vmem>>, %arg8: memref<16x256xf32, #tpu.memory_space<vmem>>) attributes {dimension_semantics = [#tpu.dimension_semantics<parallel>, #tpu.dimension_semantics<parallel>, #tpu.dimension_semantics<arbitrary>], iteration_bounds = array<i64: 1, 1, 2>, scalar_prefetch = 0 : i64, scratch_operands = 1 : i64, tpu.core_type = #tpu.core_type<tc>, window_params = [{transform_indices = @transform_0, window_bounds = array<i64: 16, 256>}, {transform_indices = @transform_1, window_bounds = array<i64: 256, 256>}, {transform_indices = @transform_2, window_bounds = array<i64: 256, 256>}, {transform_indices = @transform_3, window_bounds = array<i64: 1, 256>}, {transform_indices = @transform_4, window_bounds = array<i64: 16, 256>}]} {
    %c0_i32 = arith.constant 0 : i32
    %0 = arith.cmpi eq, %arg2, %c0_i32 : i32
    %1 = arith.extui %0 : i1 to i32
    %c0_i32_0 = arith.constant 0 : i32
    %2 = arith.cmpi ne, %1, %c0_i32_0 : i32
    scf.if %2 {
      %cst_11 = arith.constant 0.000000e+00 : f32
      %14 = vector.broadcast %cst_11 : f32 to vector<16x256xf32>
      %c0_12 = arith.constant 0 : index
      %c0_13 = arith.constant 0 : index
      %15 = vector.load %arg8[%c0_12, %c0_13] : memref<16x256xf32, #tpu.memory_space<vmem>>, vector<16x256xf32>
      tpu.vector_store %arg8[%c0_12, %c0_13], %14 {strides = array<i32>} : memref<16x256xf32, #tpu.memory_space<vmem>>, vector<16x256xf32>,
    } else {
    }
    %c0 = arith.constant 0 : index
    %c0_1 = arith.constant 0 : index
    %3 = vector.load %arg4[%c0, %c0_1] : memref<256x256xf32, #tpu.memory_space<vmem>>, vector<256x256xf32>
    %c0_2 = arith.constant 0 : index
    %c0_3 = arith.constant 0 : index
    %4 = vector.load %arg5[%c0_2, %c0_3] : memref<256x256xf32, #tpu.memory_space<vmem>>, vector<256x256xf32>
    %5 = arith.mulf %3, %4 : vector<256x256xf32>
    %c0_4 = arith.constant 0 : index
    %c0_5 = arith.constant 0 : index
    %6 = vector.load %arg8[%c0_4, %c0_5] : memref<16x256xf32, #tpu.memory_space<vmem>>, vector<16x256xf32>
    %c0_6 = arith.constant 0 : index
    %c0_7 = arith.constant 0 : index
    %7 = vector.load %arg3[%c0_6, %c0_7] : memref<16x256xf32, #tpu.memory_space<vmem>>, vector<16x256xf32>
    %cst = arith.constant dense<0.000000e+00> : vector<16x256xf32>
    %8 = tpu.matmul %7, %5, %cst {dimension_numbers = #tpu.dot_dimension_numbers<[1], [1], [0], [0], [0, 0, 1, 0], [], []>} : vector<16x256xf32>, vector<256x256xf32>, vector<16x256xf32> -> vector<16x256xf32>
    %9 = arith.addf %6, %8 : vector<16x256xf32>
    %c0_8 = arith.constant 0 : index
    %c0_9 = arith.constant 0 : index
    %10 = vector.load %arg8[%c0_8, %c0_9] : memref<16x256xf32, #tpu.memory_space<vmem>>, vector<16x256xf32>
    tpu.vector_store %arg8[%c0_8, %c0_9], %9 {strides = array<i32>} : memref<16x256xf32, #tpu.memory_space<vmem>>, vector<16x256xf32>,
    %c1_i32 = arith.constant 1 : i32
    %11 = arith.cmpi eq, %arg2, %c1_i32 : i32
    %12 = arith.extui %11 : i1 to i32
    %c0_i32_10 = arith.constant 0 : i32
    %13 = arith.cmpi ne, %12, %c0_i32_10 : i32
    scf.if %13 {
      %c0_11 = arith.constant 0 : index
      %c0_12 = arith.constant 0 : index
      %14 = vector.load %arg8[%c0_11, %c0_12] : memref<16x256xf32, #tpu.memory_space<vmem>>, vector<16x256xf32>
      %c0_13 = arith.constant 0 : index
      %c0_14 = arith.constant 0 : index
      %15 = vector.load %arg6[%c0_13, %c0_14] : memref<1x256xf32, #tpu.memory_space<vmem>>, vector<1x256xf32>
      %16 = vector.broadcast %15 : vector<1x256xf32> to vector<16x256xf32>
      %17 = arith.addf %14, %16 : vector<16x256xf32>
      %c0_15 = arith.constant 0 : index
      %c0_16 = arith.constant 0 : index
      %18 = vector.load %arg7[%c0_15, %c0_16] : memref<16x256xf32, #tpu.memory_space<vmem>>, vector<16x256xf32>
      tpu.vector_store %arg7[%c0_15, %c0_16], %17 {strides = array<i32>} : memref<16x256xf32, #tpu.memory_space<vmem>>, vector<16x256xf32>,
    } else {
    }
    return
  }
  func.func @transform_0(%arg0: i32, %arg1: i32, %arg2: i32) -> (i32, i32) {
    %c0_i32 = arith.constant 0 : i32
    return %arg0, %arg2 : i32, i32
  }
  func.func @transform_1(%arg0: i32, %arg1: i32, %arg2: i32) -> (i32, i32) {
    %c0_i32 = arith.constant 0 : i32
    return %arg1, %arg2 : i32, i32
  }
  func.func @transform_2(%arg0: i32, %arg1: i32, %arg2: i32) -> (i32, i32) {
    %c0_i32 = arith.constant 0 : i32
    return %arg1, %arg2 : i32, i32
  }
  func.func @transform_3(%arg0: i32, %arg1: i32, %arg2: i32) -> (i32, i32) {
    %c0_i32 = arith.constant 0 : i32
    %c0_i32_0 = arith.constant 0 : i32
    return %c0_i32, %arg1 : i32, i32
  }
  func.func @transform_4(%arg0: i32, %arg1: i32, %arg2: i32) -> (i32, i32) {
    %c0_i32 = arith.constant 0 : i32
    return %arg0, %arg1 : i32, i32
  }
}

</mosaic_0001>

<bundles_post_ra>
// kernel: one_act_linear_forward.1
= control target key start
LH: loop header
LB: loop body
LE: loop exit
PB: predicated region body
PF: predicated region fallthrough
CT: control target
= control target key end

     0   :  { %s1495_s0 = inlined_call_operand.hbm [shape: f32[16,512], index: 0, kind: input, shape index: {}]   ;;  %s1496_s1 = inlined_call_operand.hbm [shape: f32[256,512], index: 1, kind: input, shape index: {}]   ;;  %s1497_s2 = inlined_call_operand.hbm [shape: f32[256,512], index: 2, kind: input, shape index: {}]   ;;  %s1498_s3 = inlined_call_operand.vmem [shape: f32[1,256], index: 3, kind: input, shape index: {}]   ;;  %s1499_s4 = inlined_call_operand.hbm [shape: f32[16,256], index: 4, kind: output, shape index: {}]  }
   0x1   :  { %1508 = sst [smem:[#allocation15_spill]] %s1496_s1 }
   0x2   :  { %9 = vsyncpa [#allocation4], 0 }
   0x3   :  { %11 = vsyncpa [#allocation4 + $0x1], 0 }
   0x4   :  { %12 = vsyncpa [#allocation7], 0 }
   0x5   :  { %14 = vsyncpa [#allocation7 + $0x1], 0 }
   0x6   :  { %15 = vsyncpa [#allocation5], 0  ;;  %s1187_s15 = smov 0   ;;  %s1189_s16 = smov 0  }
   0x7   :  { %s1191_s17 = smov 0   ;;  %s1193_s18 = smov 0  }
   0x8   :  { %s1195_s19 = smov 0   ;;  %s1197_s20 = smov 0  }
   0x9 LB: > { %1509 = sst [smem:[#allocation13_spill]] %s1146_s19  ;;  %s1216_s21 = sadd.s32 4294967295, %s1150_s20   ;;  %s1150_s20 = sphi %s1197_s20, %s21_s20   ;;  %s1146_s19 = sphi %s1195_s19, %s1519_s19   ;;  %s1142_s18 = sphi %s1193_s18, %s1518_s18   ;;  %s1138_s17 = sphi %s1191_s17, %s1522_s17   ;;  %s1134_s16 = sphi %s1189_s16, %s1521_s16   ;;  %s1130_s15 = sphi %s1187_s15, %s1520_s15  }
   0xa   : > { %s33_s22 = sadd.s32 1, %s1146_s19  ;;  %s49_s23 = sadd.s32 1, %s1138_s17 }
   0xb   : > { %p34_p0 = scmp.ge.s32.totalorder %s33_s22, 2  ;;  %p56_p1 = scmp.ne.s32.totalorder %s1138_s17, %s1134_s16 }
   0xc   : > { %p57_p2 = scmp.eq.s32.totalorder %s1150_s20, 0  ;;  %p62_p4 = scmp.ne.s32.totalorder %s1134_s16, %s1130_s15 }
   0xd   : > { %s1524_s22 = smov (%p34_p0, %s33_s22), 0  ;;  %p63_p5 = scmp.eq.s32.totalorder %s1216_s21, 0 }
   0xe   : > { %1510 = sst [smem:[#allocation14_spill]] %s1524_s22  ;;  %p58_p3 = por %p57_p2, %p56_p1 }
   0xf   : > { %s45_s24 = ssub.s32 %s1146_s19, %s1524_s22  ;;  %p1229_p7 = por %p63_p5, %p62_p4 }
  0x10   : > { %p47_p6 = scmp.eq.s32.totalorder %s45_s24, 0  ;;  %p926_p8 = scmp.lt.s32.totalorder %s1150_s20, 2 }
  0x11   : > { %s1238_s27 = sand.u32 1, %s1138_s17   ;;  %s1241_s28 = sshll.u32 %s1146_s19, 8 }
  0x12   : > { %s1235_s26 = scalar_select %p47_p6, %s1138_s17, %s49_s23  }
  0x13   : > { %p1243_p9 = pnand %p926_p8, %p58_p3  ;;  %s228_s30 = sand.u32 1, %s1150_s20  }
  0x14   : > { %s823_s5 = sshll.u32 %s1238_s27, 9  ;;  %s1513_s1 = sld [smem:[#allocation15_spill]] }
  0x15   : > { %s232_s9 = scalar_lea.vmem [#allocation6], %s823_s5  ;;  %s256_s11 = scalar_lea.vmem [#allocation8], %s823_s5 }
  0x16   : > { %s242_s10 = sshll.u32 %s232_s9, 4  ;;  %s266_s12 = sshll.u32 %s256_s11, 4  ;;  %s243_s10 = int_to_ptr.vmem [resolvable:$true] %s242_s10  ;;  %s1266_s12 = int_to_ptr.vmem [resolvable:$true] %s266_s12 }
  0x17   : > { %s1253_s13 = scalar_lea.sflag [#allocation7], %s228_s30  ;;  %p986_p10 = pneg %p1243_p9 }
  0x18   : > { %s997_s14 = scalar_lea.vmem %s243_s10, 8192  ;;  %s1152_s15 = smov [#allocation6]  }
  0x19   : > { %p998_p11 = scmp.ne.s32.totalorder %s243_s10, %s997_s14  ;;  %s1002_s23 = sshll.u32 %s1152_s15, 4  ;;  %s1003_s23 = int_to_ptr.vmem [resolvable:$false] %s1002_s23 }
  0x1a   : > { %s241_s8 = scalar_lea.hbm %s1513_s1, %s1241_s28  ;;  %s1004_s24 = scalar_lea.vmem %s1003_s23, 16384 }
  0x1b   : > { %p1000_p12 = pnand %p998_p11, %p986_p10  ;;  %p1005_p0 = scmp.lt.s32.totalorder %s243_s10, %s1003_s23 }
  0x1c   : > { %p1006_p1 = scmp.lt.s32.totalorder %s1004_s24, %s997_s14 }
  0x1d   : > { %p1001_p13 = pneg %p1000_p12 }
  0x1e   : > { %p1007_p2 = por %p1006_p1, %p1005_p0 }
  0x20   : > { %p1008_p3 = pnand %p1007_p2, %p1001_p13 }
  0x22   : > { %1011 = shalt.err (!%p1008_p3)
}
  0x23   : > { %s1502_s5 = smov 512   ;;  %s1504_s30 = smov 256  }
  0x24   : > { %s1506_s6 = smov 16   ;;  %p829_p4 = scmp.ge.s32.totalorder %s1150_s20, 1 }
  0x25   : > { %922 = dma.hbm_to_vmem [thread:$0]  (!%p1243_p9), %s241_s8, 8192, %s243_s10, %s1253_s13, %s1502_s5, %s1504_s30, %s1506_s6  }
  0x26   : > { %p274_p5 = scmp.lt.s32.totalorder %s1150_s20, 3  ;;  %s820_s9 = sshll.u32 %s1238_s27, 5 }
  0x27   : > { %s217_s15 = scalar_lea.hbm %s1495_s0, %s1241_s28  ;;  %s208_s23 = scalar_lea.vmem [#allocation3], %s820_s9 }
  0x28   : > { %p1270_p6 = pnand %p829_p4, %p274_p5  ;;  %s218_s24 = sshll.u32 %s208_s23, 4  ;;  %s219_s24 = int_to_ptr.vmem [resolvable:$true] %s218_s24 }
  0x29   : > { %s265_s19 = scalar_lea.hbm %s1497_s2, %s1241_s28  ;;  %s205_s8 = scalar_lea.sflag [#allocation4], %s1238_s27 }
  0x2a   : > { %s1025_s10 = scalar_lea.vmem %s219_s24, 512  ;;  %s1156_s5 = smov [#allocation3]  }
  0x2b   : > { %p1026_p8 = scmp.ne.s32.totalorder %s219_s24, %s1025_s10  ;;  %s1030_s30 = sshll.u32 %s1156_s5, 4  ;;  %s1031_s30 = int_to_ptr.vmem [resolvable:$false] %s1030_s30 }
  0x2c   : > { %s1032_s6 = scalar_lea.vmem %s1031_s30, 1024  ;;  %p1033_p13 = scmp.lt.s32.totalorder %s219_s24, %s1031_s30 }
  0x2d   : > { %p1028_p11 = pnand %p1026_p8, %p986_p10  ;;  %p1034_p0 = scmp.lt.s32.totalorder %s1032_s6, %s1025_s10 }
  0x2f   : > { %p1029_p12 = pneg %p1028_p11  ;;  %p1035_p1 = por %p1034_p0, %p1033_p13 }
  0x31   : > { %p1036_p2 = pnand %p1035_p1, %p1029_p12 }
  0x33   : > { %1039 = shalt.err (!%p1036_p2)
}
  0x34   : > { %s1515_s1 = smov 16   ;;  %s1516_s22 = smov 256  }
  0x35   : > { %s1517_s27 = smov 512   ;;  %s1053_s9 = scalar_lea.vmem %s1266_s12, 8192 }
  0x36   : > { %919 = dma.hbm_to_vmem [thread:$0]  (!%p1243_p9), %s217_s15, 512, %s219_s24, %s205_s8, %s1517_s27, %s1516_s22, %s1515_s1  }
  0x37   : > { %p1054_p3 = scmp.ne.s32.totalorder %s1266_s12, %s1053_s9  ;;  %s1157_s5 = smov [#allocation8]  }
  0x38   : > { %s1058_s30 = sshll.u32 %s1157_s5, 4  ;;  %s1059_s30 = int_to_ptr.vmem [resolvable:$false] %s1058_s30 }
  0x39   : > { %p1056_p4 = pnand %p1054_p3, %p986_p10  ;;  %s1060_s6 = scalar_lea.vmem %s1059_s30, 16384 }
  0x3a   : > { %p1061_p8 = scmp.lt.s32.totalorder %s1266_s12, %s1059_s30  ;;  %p1062_p11 = scmp.lt.s32.totalorder %s1060_s6, %s1053_s9 }
  0x3b   : > { %p1057_p5 = pneg %p1056_p4 }
  0x3c   : > { %p1063_p12 = por %p1062_p11, %p1061_p8 }
  0x3e   : > { %p1064_p13 = pnand %p1063_p12, %p1057_p5 }
  0x40   : > { %1067 = shalt.err (!%p1064_p13)
}
  0x41   : > { %925 = dma.hbm_to_vmem [thread:$0]  (!%p1243_p9), %s265_s19, 8192, %s1266_s12, %s1253_s13, %s1517_s27, %s1516_s22, %s1515_s1  }
  0x42   : > { %278 = sbr.rel (%p1270_p6) target bundleno = 443 (0x1bb), region = 36  ;;  %s280_s15 = sand.u32 (!%p1270_p6), 1, %s1134_s16  }
  0x43   : > { %s830_s23 = sshll.u32 (!%p1270_p6), %s280_s15, 5  ;;  %s281_s24 = scalar_lea.sflag (!%p1270_p6), [#allocation4], %s280_s15 }
  0x44   : > { %s1313_s29 = scalar_lea.vmem (!%p1270_p6), [#allocation3], %s830_s23 }
  0x47   : > { %1117 = dma.done.wait (%p1229_p7), %s281_s24, 512  }
  0x48   : > { %1119 = vsyncadd (%p1229_p7), %s281_s24, 4294966784  ;;  %s289_s8 = sand.u32 1, %s1216_s21   ;;  %s831_s28 = sshll.u32 %s280_s15, 9 }
  0x49   : > { %s290_s19 = scalar_lea.sflag [#allocation7], %s289_s8  ;;  %s1320_s12 = scalar_lea.vmem [#allocation6], %s831_s28 }
  0x4a   : > { %1121 = dma.done.wait (%p1229_p7), %s290_s19, 16384  }
  0x4b   : > { %1123 = vsyncadd (%p1229_p7), %s290_s19, 4294950912  ;;  %s1326_s13 = scalar_lea.vmem [#allocation8], %s831_s28  ;;  %p833_p9 = scmp.ne.s32.totalorder %s1142_s18, 0 }
  0x4d   : > { %352 = sbr.rel (%p833_p9) target bundleno = 85 (0x55), region = 52 }
  0x52   : > { %v1158_v0 = vmov 0.0  }
  0x53   : > { %353 = vst [vmem:[#allocation2 + $0x10] sm:$0xff] %v1158_v0  ;;  %354 = vst [vmem:[#allocation2] sm:$0xff] %v1158_v0 }
  0x54   : > { %355 = vst [vmem:[#allocation2 + $0x18] sm:$0xff] %v1158_v0  ;;  %356 = vst [vmem:[#allocation2 + $0x8] sm:$0xff] %v1158_v0 }
  0x55 PF: > { %v388_v1 = vld [vmem:[%s1320_s12 + $0xf8] sm:$0xff]  ;;  %v387_v3 = vld [vmem:[%s1320_s12 + $0xf0] sm:$0xff]  ;;  %v386_v6 = vld [vmem:[%s1320_s12 + $0xe8] sm:$0xff]  ;;  %p834_p7 = scmp.ne.s32.totalorder %s1142_s18, 1 }
  0x56   : > { %v452_v2 = vld [vmem:[%s1326_s13 + $0xf8] sm:$0xff]  ;;  %v451_v5 = vld [vmem:[%s1326_s13 + $0xf0] sm:$0xff]  ;;  %v450_v7 = vld [vmem:[%s1326_s13 + $0xe8] sm:$0xff] }
  0x57   : > { %v516_v4 = vmul.f32 %v452_v2, %v388_v1  ;;  %v515_v8 = vmul.f32 %v451_v5, %v387_v3  ;;  %v514_v9 = vmul.f32 %v450_v7, %v386_v6  ;;  %v385_v10 = vld [vmem:[%s1320_s12 + $0xe0] sm:$0xff]  ;;  %v384_v12 = vld [vmem:[%s1320_s12 + $0xd8] sm:$0xff]  ;;  %v383_v16 = vld [vmem:[%s1320_s12 + $0xd0] sm:$0xff] }
  0x58   : > { %v449_v11 = vld [vmem:[%s1326_s13 + $0xe0] sm:$0xff]  ;;  %v448_v13 = vld [vmem:[%s1326_s13 + $0xd8] sm:$0xff]  ;;  %v447_v17 = vld [vmem:[%s1326_s13 + $0xd0] sm:$0xff] }
  0x59   : > { %557 = vmatprep.subr.mxu0 %v516_v4  ;;  %842 = vmatprep.subr.mxu1 %v516_v4  ;;  %v513_v14 = vmul.f32 %v449_v11, %v385_v10  ;;  %v512_v15 = vmul.f32 %v448_v13, %v384_v12  ;;  %v382_v18 = vld [vmem:[%s1320_s12 + $0xc8] sm:$0xff]  ;;  %v511_v20 = vmul.f32 %v447_v17, %v383_v16  ;;  %v381_v22 = vld [vmem:[%s1320_s12 + $0xc0] sm:$0xff]  ;;  %v380_v24 = vld [vmem:[%s1320_s12 + $0xb8] sm:$0xff] }
  0x5a   : > { %558 = vmatpush1.xpose.msra.mxu0 %v515_v8  ;;  %874 = vmatpush1.xpose.msra.mxu1 %v515_v8  ;;  %v446_v19 = vld [vmem:[%s1326_s13 + $0xc8] sm:$0xff]  ;;  %v445_v23 = vld [vmem:[%s1326_s13 + $0xc0] sm:$0xff]  ;;  %v444_v25 = vld [vmem:[%s1326_s13 + $0xb8] sm:$0xff] }
  0x5b   : > { %559 = vmatprep.subr.mxu0 %v514_v9  ;;  %843 = vmatprep.subr.mxu1 %v514_v9  ;;  %v510_v21 = vmul.f32 %v446_v19, %v382_v18  ;;  %v509_v26 = vmul.f32 %v445_v23, %v381_v22  ;;  %v508_v27 = vmul.f32 %v444_v25, %v380_v24  ;;  %v379_v28 = vld [vmem:[%s1320_s12 + $0xb0] sm:$0xff]  ;;  %v378_v30 = vld [vmem:[%s1320_s12 + $0xa8] sm:$0xff]  ;;  %v377_v34 = vld [vmem:[%s1320_s12 + $0xa0] sm:$0xff] }
  0x5c   : > { %v443_v29 = vld [vmem:[%s1326_s13 + $0xb0] sm:$0xff]  ;;  %v442_v31 = vld [vmem:[%s1326_s13 + $0xa8] sm:$0xff]  ;;  %v441_v35 = vld [vmem:[%s1326_s13 + $0xa0] sm:$0xff] }
  0x5d   : > { %v507_v32 = vmul.f32 %v443_v29, %v379_v28  ;;  %v506_v33 = vmul.f32 %v442_v31, %v378_v30  ;;  %v376_v36 = vld [vmem:[%s1320_s12 + $0x98] sm:$0xff]  ;;  %v505_v38 = vmul.f32 %v441_v35, %v377_v34  ;;  %v375_v40 = vld [vmem:[%s1320_s12 + $0x90] sm:$0xff]  ;;  %v374_v42 = vld [vmem:[%s1320_s12 + $0x88] sm:$0xff] }
  0x5e   : > { %560 = vmatpush1.xpose.msra.mxu0 %v513_v14  ;;  %875 = vmatpush1.xpose.msra.mxu1 %v513_v14  ;;  %v440_v37 = vld [vmem:[%s1326_s13 + $0x98] sm:$0xff]  ;;  %v439_v41 = vld [vmem:[%s1326_s13 + $0x90] sm:$0xff]  ;;  %v438_v43 = vld [vmem:[%s1326_s13 + $0x88] sm:$0xff] }
  0x5f   : > { %561 = vmatprep.subr.mxu0 %v512_v15  ;;  %844 = vmatprep.subr.mxu1 %v512_v15  ;;  %v504_v39 = vmul.f32 %v440_v37, %v376_v36  ;;  %v503_v44 = vmul.f32 %v439_v41, %v375_v40  ;;  %v502_v45 = vmul.f32 %v438_v43, %v374_v42  ;;  %v373_v46 = vld [vmem:[%s1320_s12 + $0x80] sm:$0xff]  ;;  %v372_v48 = vld [vmem:[%s1320_s12 + $0x78] sm:$0xff]  ;;  %v371_v52 = vld [vmem:[%s1320_s12 + $0x70] sm:$0xff] }
  0x60   : > { %v437_v47 = vld [vmem:[%s1326_s13 + $0x80] sm:$0xff]  ;;  %v436_v49 = vld [vmem:[%s1326_s13 + $0x78] sm:$0xff]  ;;  %v435_v53 = vld [vmem:[%s1326_s13 + $0x70] sm:$0xff] }
  0x61   : > { %v501_v50 = vmul.f32 %v437_v47, %v373_v46  ;;  %v500_v51 = vmul.f32 %v436_v49, %v372_v48  ;;  %v370_v54 = vld [vmem:[%s1320_s12 + $0x68] sm:$0xff]  ;;  %v499_v56 = vmul.f32 %v435_v53, %v371_v52  ;;  %v369_v58 = vld [vmem:[%s1320_s12 + $0x60] sm:$0xff]  ;;  %v368_v60 = vld [vmem:[%s1320_s12 + $0x58] sm:$0xff] }
  0x62   : > { %562 = vmatpush1.xpose.msra.mxu0 %v511_v20  ;;  %876 = vmatpush1.xpose.msra.mxu1 %v511_v20  ;;  %v434_v55 = vld [vmem:[%s1326_s13 + $0x68] sm:$0xff]  ;;  %v433_v59 = vld [vmem:[%s1326_s13 + $0x60] sm:$0xff]  ;;  %v432_v61 = vld [vmem:[%s1326_s13 + $0x58] sm:$0xff] }
  0x63   : > { %563 = vmatprep.subr.mxu0 %v510_v21  ;;  %845 = vmatprep.subr.mxu1 %v510_v21  ;;  %v498_v57 = vmul.f32 %v434_v55, %v370_v54  ;;  %v497_v62 = vmul.f32 %v433_v59, %v369_v58  ;;  %v496_v63 = vmul.f32 %v432_v61, %v368_v60  ;;  %v367_v0 = vld [vmem:[%s1320_s12 + $0x50] sm:$0xff]  ;;  %v366_v2 = vld [vmem:[%s1320_s12 + $0x48] sm:$0xff]  ;;  %v365_v6 = vld [vmem:[%s1320_s12 + $0x40] sm:$0xff] }
  0x64   : > { %v431_v1 = vld [vmem:[%s1326_s13 + $0x50] sm:$0xff]  ;;  %v430_v3 = vld [vmem:[%s1326_s13 + $0x48] sm:$0xff]  ;;  %v429_v7 = vld [vmem:[%s1326_s13 + $0x40] sm:$0xff] }
  0x65   : > { %v495_v4 = vmul.f32 %v431_v1, %v367_v0  ;;  %v494_v5 = vmul.f32 %v430_v3, %v366_v2  ;;  %v364_v8 = vld [vmem:[%s1320_s12 + $0x38] sm:$0xff]  ;;  %v554_v10 = vld [vmem:[%s1313_s29 + $0x8] sm:$0xff]  ;;  %v493_v12 = vmul.f32 %v429_v7, %v365_v6  ;;  %v363_v14 = vld [vmem:[%s1320_s12 + $0x30] sm:$0xff] }
  0x66   : > { %564 = vmatpush1.xpose.msra.mxu0 %v509_v26  ;;  %877 = vmatpush1.xpose.msra.mxu1 %v509_v26  ;;  %v428_v9 = vld [vmem:[%s1326_s13 + $0x38] sm:$0xff]  ;;  %v427_v15 = vld [vmem:[%s1326_s13 + $0x30] sm:$0xff]  ;;  %v362_v16 = vld [vmem:[%s1320_s12 + $0x28] sm:$0xff] }
  0x67   : > { %565 = vmatprep.subr.mxu0 %v508_v27  ;;  %846 = vmatprep.subr.mxu1 %v508_v27  ;;  %v556_v11 = vld [vmem:[%s1313_s29 + $0x18] sm:$0xff]  ;;  %v492_v13 = vmul.f32 %v428_v9, %v364_v8  ;;  %v426_v17 = vld [vmem:[%s1326_s13 + $0x28] sm:$0xff]  ;;  %v491_v18 = vmul.f32 %v427_v15, %v363_v14  ;;  %v361_v20 = vld [vmem:[%s1320_s12 + $0x20] sm:$0xff] }
  0x68   : > { %621 = vmatprep.mubr.f32.mxu0 %v554_v10  ;;  %627 = vmatprep.mubr.f32.mxu1 %v556_v11  ;;  %v490_v19 = vmul.f32 %v426_v17, %v362_v16  ;;  %v425_v21 = vld [vmem:[%s1326_s13 + $0x20] sm:$0xff]  ;;  %v360_v22 = vld [vmem:[%s1320_s12 + $0x18] sm:$0xff]  ;;  %v359_v26 = vld [vmem:[%s1320_s12 + $0x10] sm:$0xff] }
  0x69   : > { %v424_v23 = vld [vmem:[%s1326_s13 + $0x18] sm:$0xff]  ;;  %v489_v24 = vmul.f32 %v425_v21, %v361_v20  ;;  %v423_v27 = vld [vmem:[%s1326_s13 + $0x10] sm:$0xff]  ;;  %v358_v28 = vld [vmem:[%s1320_s12 + $0x8] sm:$0xff] }
  0x6a   : > { %566 = vmatpush1.xpose.msra.mxu0 %v507_v32  ;;  %878 = vmatpush1.xpose.msra.mxu1 %v507_v32  ;;  %v488_v25 = vmul.f32 %v424_v23, %v360_v22  ;;  %v422_v29 = vld [vmem:[%s1326_s13 + $0x8] sm:$0xff]  ;;  %v487_v30 = vmul.f32 %v423_v27, %v359_v26  ;;  %v357_v32 = vld [vmem:[%s1320_s12] sm:$0xff]  ;;  %v420_v34 = vld [vmem:[%s1320_s12 + $0x1f8] sm:$0xff] }
  0x6b   : > { %567 = vmatprep.subr.mxu0 %v506_v33  ;;  %847 = vmatprep.subr.mxu1 %v506_v33  ;;  %v486_v31 = vmul.f32 %v422_v29, %v358_v28  ;;  %v421_v33 = vld [vmem:[%s1326_s13] sm:$0xff]  ;;  %v484_v35 = vld [vmem:[%s1326_s13 + $0x1f8] sm:$0xff]  ;;  %v418_v40 = vld [vmem:[%s1320_s12 + $0x1e8] sm:$0xff] }
  0x6c   : > { %v485_v36 = vmul.f32 %v421_v33, %v357_v32  ;;  %v548_v37 = vmul.f32 %v484_v35, %v420_v34  ;;  %v482_v41 = vld [vmem:[%s1326_s13 + $0x1e8] sm:$0xff]  ;;  %v416_v46 = vld [vmem:[%s1320_s12 + $0x1d8] sm:$0xff]  ;;  %v407_v10 = vld [vmem:[%s1320_s12 + $0x190] sm:$0xff] }
  0x6d   : > { %v546_v43 = vmul.f32 %v482_v41, %v418_v40  ;;  %v480_v47 = vld [vmem:[%s1326_s13 + $0x1d8] sm:$0xff]  ;;  %v414_v52 = vld [vmem:[%s1320_s12 + $0x1c8] sm:$0xff]  ;;  %v471_v11 = vld [vmem:[%s1326_s13 + $0x190] sm:$0xff] }
  0x6e   : > { %568 = vmatpush1.xpose.msra.mxu0 %v505_v38  ;;  %879 = vmatpush1.xpose.msra.mxu1 %v505_v38  ;;  %v419_v38 = vld [vmem:[%s1320_s12 + $0x1f0] sm:$0xff]  ;;  %v544_v49 = vmul.f32 %v480_v47, %v416_v46  ;;  %v478_v53 = vld [vmem:[%s1326_s13 + $0x1c8] sm:$0xff]  ;;  %v412_v58 = vld [vmem:[%s1320_s12 + $0x1b8] sm:$0xff]  ;;  %v535_v14 = vmul.f32 %v471_v11, %v407_v10 }
  0x6f   : > { %569 = vmatprep.subr.mxu0 %v504_v39  ;;  %848 = vmatprep.subr.mxu1 %v504_v39  ;;  %v483_v39 = vld [vmem:[%s1326_s13 + $0x1f0] sm:$0xff]  ;;  %v542_v55 = vmul.f32 %v478_v53, %v414_v52  ;;  %v476_v59 = vld [vmem:[%s1326_s13 + $0x1b8] sm:$0xff]  ;;  %v410_v0 = vld [vmem:[%s1320_s12 + $0x1a8] sm:$0xff] }
  0x70   : > { %v547_v42 = vmul.f32 %v483_v39, %v419_v38  ;;  %v540_v61 = vmul.f32 %v476_v59, %v412_v58  ;;  %v474_v1 = vld [vmem:[%s1326_s13 + $0x1a8] sm:$0xff]  ;;  %v408_v6 = vld [vmem:[%s1320_s12 + $0x198] sm:$0xff]  ;;  %v405_v16 = vld [vmem:[%s1320_s12 + $0x180] sm:$0xff] }
  0x71   : > { %v538_v3 = vmul.f32 %v474_v1, %v410_v0  ;;  %v472_v7 = vld [vmem:[%s1326_s13 + $0x198] sm:$0xff]  ;;  %v469_v17 = vld [vmem:[%s1326_s13 + $0x180] sm:$0xff]  ;;  %v403_v22 = vld [vmem:[%s1320_s12 + $0x170] sm:$0xff] }
  0x72   : > { %570 = vmatpush1.xpose.msra.mxu0 %v503_v44  ;;  %880 = vmatpush1.xpose.msra.mxu1 %v503_v44  ;;  %v417_v44 = vld [vmem:[%s1320_s12 + $0x1e0] sm:$0xff]  ;;  %v536_v9 = vmul.f32 %v472_v7, %v408_v6  ;;  %v533_v20 = vmul.f32 %v469_v17, %v405_v16  ;;  %v467_v23 = vld [vmem:[%s1326_s13 + $0x170] sm:$0xff]  ;;  %v551_v6 = vld [vmem:[#allocation2 + $0x18] sm:$0xff] }
  0x73   : > { %571 = vmatprep.subr.mxu0 %v502_v45  ;;  %849 = vmatprep.subr.mxu1 %v502_v45  ;;  %v481_v45 = vld [vmem:[%s1326_s13 + $0x1e0] sm:$0xff]  ;;  %v531_v26 = vmul.f32 %v467_v23, %v403_v22  ;;  %v399_v34 = vld [vmem:[%s1320_s12 + $0x150] sm:$0xff]  ;;  %v552_v10 = vld [vmem:[#allocation2 + $0x8] sm:$0xff] }
  0x74   : > { %v545_v48 = vmul.f32 %v481_v45, %v417_v44  ;;  %v401_v28 = vld [vmem:[%s1320_s12 + $0x160] sm:$0xff]  ;;  %v463_v35 = vld [vmem:[%s1326_s13 + $0x150] sm:$0xff] }
  0x75   : > { %v465_v29 = vld [vmem:[%s1326_s13 + $0x160] sm:$0xff]  ;;  %v527_v38 = vmul.f32 %v463_v35, %v399_v34  ;;  %v395_v46 = vld [vmem:[%s1320_s12 + $0x130] sm:$0xff] }
  0x76   : > { %572 = vmatpush1.xpose.msra.mxu0 %v501_v50  ;;  %881 = vmatpush1.xpose.msra.mxu1 %v501_v50  ;;  %v415_v50 = vld [vmem:[%s1320_s12 + $0x1d0] sm:$0xff]  ;;  %v529_v32 = vmul.f32 %v465_v29, %v401_v28  ;;  %v397_v40 = vld [vmem:[%s1320_s12 + $0x140] sm:$0xff] }
  0x77   : > { %573 = vmatprep.subr.mxu0 %v500_v51  ;;  %850 = vmatprep.subr.mxu1 %v500_v51  ;;  %v479_v51 = vld [vmem:[%s1326_s13 + $0x1d0] sm:$0xff]  ;;  %v461_v41 = vld [vmem:[%s1326_s13 + $0x140] sm:$0xff] }
  0x78   : > { %v543_v54 = vmul.f32 %v479_v51, %v415_v50  ;;  %v525_v44 = vmul.f32 %v461_v41, %v397_v40  ;;  %v459_v47 = vld [vmem:[%s1326_s13 + $0x130] sm:$0xff]  ;;  %v393_v52 = vld [vmem:[%s1320_s12 + $0x120] sm:$0xff] }
  0x79   : > { %v523_v50 = vmul.f32 %v459_v47, %v395_v46  ;;  %v457_v53 = vld [vmem:[%s1326_s13 + $0x120] sm:$0xff]  ;;  %v391_v58 = vld [vmem:[%s1320_s12 + $0x110] sm:$0xff] }
  0x7a   : > { %574 = vmatpush1.xpose.msra.mxu0 %v499_v56  ;;  %882 = vmatpush1.xpose.msra.mxu1 %v499_v56  ;;  %v413_v56 = vld [vmem:[%s1320_s12 + $0x1c0] sm:$0xff]  ;;  %v455_v59 = vld [vmem:[%s1326_s13 + $0x110] sm:$0xff] }
  0x7b   : > { %575 = vmatprep.subr.mxu0 %v498_v57  ;;  %851 = vmatprep.subr.mxu1 %v498_v57  ;;  %v477_v57 = vld [vmem:[%s1326_s13 + $0x1c0] sm:$0xff] }
  0x7c   : > { %v541_v60 = vmul.f32 %v477_v57, %v413_v56  ;;  %v521_v56 = vmul.f32 %v457_v53, %v393_v52  ;;  %v389_v0 = vld [vmem:[%s1320_s12 + $0x100] sm:$0xff] }
  0x7d   : > { %v453_v1 = vld [vmem:[%s1326_s13 + $0x100] sm:$0xff] }
  0x7e   : > { %576 = vmatpush1.xpose.msra.mxu0 %v497_v62  ;;  %883 = vmatpush1.xpose.msra.mxu1 %v497_v62  ;;  %v411_v62 = vld [vmem:[%s1320_s12 + $0x1b0] sm:$0xff] }
  0x7f   : > { %577 = vmatprep.subr.mxu0 %v496_v63  ;;  %852 = vmatprep.subr.mxu1 %v496_v63  ;;  %v475_v63 = vld [vmem:[%s1326_s13 + $0x1b0] sm:$0xff] }
  0x80   : > { %v539_v2 = vmul.f32 %v475_v63, %v411_v62  ;;  %v519_v62 = vmul.f32 %v455_v59, %v391_v58 }
  0x82   : > { %578 = vmatpush1.xpose.msra.mxu0 %v495_v4  ;;  %884 = vmatpush1.xpose.msra.mxu1 %v495_v4  ;;  %v409_v4 = vld [vmem:[%s1320_s12 + $0x1a0] sm:$0xff] }
  0x83   : > { %579 = vmatprep.subr.mxu0 %v494_v5  ;;  %853 = vmatprep.subr.mxu1 %v494_v5  ;;  %v473_v5 = vld [vmem:[%s1326_s13 + $0x1a0] sm:$0xff] }
  0x84   : > { %v537_v8 = vmul.f32 %v473_v5, %v409_v4  ;;  %v555_v4 = vld [vmem:[%s1313_s29 + $0x10] sm:$0xff] }
  0x85   : > { %v549_v5 = vld [vmem:[#allocation2 + $0x10] sm:$0xff] }
  0x86   : > { %580 = vmatpush1.xpose.msra.mxu0 %v493_v12  ;;  %885 = vmatpush1.xpose.msra.mxu1 %v493_v12  ;;  %v406_v12 = vld [vmem:[%s1320_s12 + $0x188] sm:$0xff] }
  0x87   : > { %581 = vmatprep.subr.mxu0 %v492_v13  ;;  %854 = vmatprep.subr.mxu1 %v492_v13  ;;  %v470_v13 = vld [vmem:[%s1326_s13 + $0x188] sm:$0xff] }
  0x88   : > { %v534_v15 = vmul.f32 %v470_v13, %v406_v12 }
  0x8a   : > { %582 = vmatpush1.xpose.msra.mxu0 %v491_v18  ;;  %886 = vmatpush1.xpose.msra.mxu1 %v491_v18  ;;  %v404_v18 = vld [vmem:[%s1320_s12 + $0x178] sm:$0xff] }
  0x8b   : > { %583 = vmatprep.subr.mxu0 %v490_v19  ;;  %855 = vmatprep.subr.mxu1 %v490_v19  ;;  %v468_v19 = vld [vmem:[%s1326_s13 + $0x178] sm:$0xff] }
  0x8c   : > { %v532_v21 = vmul.f32 %v468_v19, %v404_v18 }
  0x8e   : > { %584 = vmatpush1.xpose.msra.mxu0 %v489_v24  ;;  %887 = vmatpush1.xpose.msra.mxu1 %v489_v24  ;;  %v402_v24 = vld [vmem:[%s1320_s12 + $0x168] sm:$0xff] }
  0x8f   : > { %585 = vmatprep.subr.mxu0 %v488_v25  ;;  %856 = vmatprep.subr.mxu1 %v488_v25  ;;  %v466_v25 = vld [vmem:[%s1326_s13 + $0x168] sm:$0xff] }
  0x90   : > { %v530_v27 = vmul.f32 %v466_v25, %v402_v24 }
  0x92   : > { %586 = vmatpush1.xpose.msra.mxu0 %v487_v30  ;;  %888 = vmatpush1.xpose.msra.mxu1 %v487_v30  ;;  %v400_v30 = vld [vmem:[%s1320_s12 + $0x158] sm:$0xff] }
  0x93   : > { %587 = vmatprep.subr.mxu0 %v486_v31  ;;  %857 = vmatprep.subr.mxu1 %v486_v31  ;;  %v464_v31 = vld [vmem:[%s1326_s13 + $0x158] sm:$0xff] }
  0x94   : > { %v528_v33 = vmul.f32 %v464_v31, %v400_v30 }
  0x96   : > { %588 = vmatpush1.xpose.msra.mxu0 %v485_v36  ;;  %889 = vmatpush1.xpose.msra.mxu1 %v485_v36  ;;  %v398_v36 = vld [vmem:[%s1320_s12 + $0x148] sm:$0xff] }
  0x97   : > { %589 = vmatprep.subr.mxu0 %v548_v37  ;;  %858 = vmatprep.subr.mxu1 %v548_v37  ;;  %v462_v37 = vld [vmem:[%s1326_s13 + $0x148] sm:$0xff] }
  0x98   : > { %v526_v39 = vmul.f32 %v462_v37, %v398_v36 }
  0x9a   : > { %590 = vmatpush2.xpose.msra.mxu0 %v547_v42  ;;  %890 = vmatpush2.xpose.msra.mxu1 %v547_v42  ;;  %v396_v42 = vld [vmem:[%s1320_s12 + $0x138] sm:$0xff] }
  0x9b   : > { %591 = vmatprep.subr.mxu0 %v546_v43  ;;  %859 = vmatprep.subr.mxu1 %v546_v43  ;;  %v460_v43 = vld [vmem:[%s1326_s13 + $0x138] sm:$0xff] }
  0x9c   : > { %v524_v45 = vmul.f32 %v460_v43, %v396_v42 }
  0x9e   : > { %592 = vmatpush2.xpose.msra.mxu0 %v545_v48  ;;  %891 = vmatpush2.xpose.msra.mxu1 %v545_v48  ;;  %v394_v48 = vld [vmem:[%s1320_s12 + $0x128] sm:$0xff] }
  0x9f   : > { %593 = vmatprep.subr.mxu0 %v544_v49  ;;  %860 = vmatprep.subr.mxu1 %v544_v49  ;;  %v458_v49 = vld [vmem:[%s1326_s13 + $0x128] sm:$0xff] }
  0xa0   : > { %v522_v51 = vmul.f32 %v458_v49, %v394_v48 }
  0xa2   : > { %594 = vmatpush2.xpose.msra.mxu0 %v543_v54  ;;  %892 = vmatpush2.xpose.msra.mxu1 %v543_v54  ;;  %v392_v54 = vld [vmem:[%s1320_s12 + $0x118] sm:$0xff] }
  0xa3   : > { %595 = vmatprep.subr.mxu0 %v542_v55  ;;  %861 = vmatprep.subr.mxu1 %v542_v55  ;;  %v456_v55 = vld [vmem:[%s1326_s13 + $0x118] sm:$0xff] }
  0xa4   : > { %v520_v57 = vmul.f32 %v456_v55, %v392_v54 }
  0xa6   : > { %596 = vmatpush2.xpose.msra.mxu0 %v541_v60  ;;  %893 = vmatpush2.xpose.msra.mxu1 %v541_v60  ;;  %v390_v60 = vld [vmem:[%s1320_s12 + $0x108] sm:$0xff] }
  0xa7   : > { %597 = vmatprep.subr.mxu0 %v540_v61  ;;  %862 = vmatprep.subr.mxu1 %v540_v61  ;;  %v454_v61 = vld [vmem:[%s1326_s13 + $0x108] sm:$0xff] }
  0xa8   : > { %v518_v63 = vmul.f32 %v454_v61, %v390_v60 }
  0xaa   : > { %598 = vmatpush2.xpose.msra.mxu0 %v539_v2  ;;  %894 = vmatpush2.xpose.msra.mxu1 %v539_v2  ;;  %v517_v2 = vmul.f32 %v453_v1, %v389_v0 }
  0xab   : > { %599 = vmatprep.subr.mxu0 %v538_v3  ;;  %863 = vmatprep.subr.mxu1 %v538_v3  ;;  %v553_v3 = vld [vmem:[%s1313_s29] sm:$0xff] }
  0xae   : > { %600 = vmatpush2.xpose.msra.mxu0 %v537_v8  ;;  %895 = vmatpush2.xpose.msra.mxu1 %v537_v8 }
  0xaf   : > { %601 = vmatprep.subr.mxu0 %v536_v9  ;;  %864 = vmatprep.subr.mxu1 %v536_v9  ;;  %v550_v9 = vld [vmem:[#allocation2] sm:$0xff] }
  0xb2   : > { %602 = vmatpush2.xpose.msra.mxu0 %v535_v14  ;;  %896 = vmatpush2.xpose.msra.mxu1 %v535_v14 }
  0xb3   : > { %603 = vmatprep.subr.mxu0 %v534_v15  ;;  %865 = vmatprep.subr.mxu1 %v534_v15 }
  0xb6   : > { %604 = vmatpush2.xpose.msra.mxu0 %v533_v20  ;;  %897 = vmatpush2.xpose.msra.mxu1 %v533_v20 }
  0xb7   : > { %605 = vmatprep.subr.mxu0 %v532_v21  ;;  %866 = vmatprep.subr.mxu1 %v532_v21 }
  0xba   : > { %606 = vmatpush2.xpose.msra.mxu0 %v531_v26  ;;  %898 = vmatpush2.xpose.msra.mxu1 %v531_v26 }
  0xbb   : > { %607 = vmatprep.subr.mxu0 %v530_v27  ;;  %867 = vmatprep.subr.mxu1 %v530_v27 }
  0xbe   : > { %608 = vmatpush2.xpose.msra.mxu0 %v529_v32  ;;  %899 = vmatpush2.xpose.msra.mxu1 %v529_v32 }
  0xbf   : > { %609 = vmatprep.subr.mxu0 %v528_v33  ;;  %868 = vmatprep.subr.mxu1 %v528_v33 }
  0xc2   : > { %610 = vmatpush2.xpose.msra.mxu0 %v527_v38  ;;  %900 = vmatpush2.xpose.msra.mxu1 %v527_v38 }
  0xc3   : > { %611 = vmatprep.subr.mxu0 %v526_v39  ;;  %869 = vmatprep.subr.mxu1 %v526_v39 }
  0xc6   : > { %612 = vmatpush2.xpose.msra.mxu0 %v525_v44  ;;  %901 = vmatpush2.xpose.msra.mxu1 %v525_v44 }
  0xc7   : > { %613 = vmatprep.subr.mxu0 %v524_v45  ;;  %870 = vmatprep.subr.mxu1 %v524_v45 }
  0xca   : > { %614 = vmatpush2.xpose.msra.mxu0 %v523_v50  ;;  %902 = vmatpush2.xpose.msra.mxu1 %v523_v50 }
  0xcb   : > { %615 = vmatprep.subr.mxu0 %v522_v51  ;;  %871 = vmatprep.subr.mxu1 %v522_v51 }
  0xce   : > { %616 = vmatpush2.xpose.msra.mxu0 %v521_v56  ;;  %903 = vmatpush2.xpose.msra.mxu1 %v521_v56 }
  0xcf   : > { %617 = vmatprep.subr.mxu0 %v520_v57  ;;  %872 = vmatprep.subr.mxu1 %v520_v57 }
  0xd2   : > { %618 = vmatpush2.xpose.msra.mxu0 %v519_v62  ;;  %904 = vmatpush2.xpose.msra.mxu1 %v519_v62 }
  0xd3   : > { %619 = vmatprep.subr.mxu0 %v518_v63  ;;  %873 = vmatprep.subr.mxu1 %v518_v63 }
  0xd6   : > { %620 = vmatpush2.xpose.msra.mxu0 %v517_v2  ;;  %905 = vmatpush2.xpose.msra.mxu1 %v517_v2 }
  0xd9   : > { %622 = vmatmul.mubr.f32.vlgmr.msra.gmra.mxu0 %v553_v3  ;;  %628 = vmatmul.mubr.f32.vlgmr.msra.gmra.mxu1 %v555_v4 }
 0x199   : > { %v623_v7 = vpop.f32.mrf.mxu0  ;;  %v629_v8 = vpop.f32.mrf.mxu1 }
 0x19a   : > { %v634_v11 = vadd.f32 %v623_v7, %v549_v5  ;;  %v636_v12 = vadd.f32 %v629_v8, %v551_v6  ;;  %645 = sbr.rel (%p834_p7) target bundleno = 427 (0x1ab), region = 56 }
 0x19b   : > { %v625_v13 = vpop.f32.mrf.mxu0  ;;  %v631_v14 = vpop.f32.mrf.mxu1 }
 0x19c   : > { %638 = vst [vmem:[#allocation2 + $0x10] sm:$0xff] %v634_v11  ;;  %640 = vst [vmem:[#allocation2 + $0x18] sm:$0xff] %v636_v12  ;;  %v635_v15 = vadd.f32 %v625_v13, %v550_v9  ;;  %v637_v16 = vadd.f32 %v631_v14, %v552_v10 }
 0x19e   : > { %639 = vst [vmem:[#allocation2] sm:$0xff] %v635_v15  ;;  %641 = vst [vmem:[#allocation2 + $0x8] sm:$0xff] %v637_v16 }
 0x19f   : > { %v652_v17 = vlaneseq  ;;  %v650_v19 = vld [vmem:[%s1498_s3] sm:$0x3] }
 0x1a1   : > { %v653_v18 = vshrl.u32 %v652_v17, 7 }
 0x1a3   : > { %v646_v20 = vld [vmem:[#allocation2 + $0x10] sm:$0xff]  ;;  %v654_v21 = vsub.s32 0, %v653_v18  ;;  %v658_v22 = vsub.s32 1, %v653_v18  ;;  %v648_v24 = vld [vmem:[#allocation2 + $0x18] sm:$0xff] }
 0x1a5   : > { %v647_v23 = vld [vmem:[#allocation2] sm:$0xff]  ;;  %v649_v25 = vld [vmem:[#allocation2 + $0x8] sm:$0xff]  ;;  %v655_v26 = vrot.slane %v650_v19, %v654_v21  ;;  %v659_v27 = vrot.slane %v650_v19, %v658_v22 }
 0x1a7   : > { %v662_v28 = vadd.f32 %v655_v26, %v646_v20  ;;  %v663_v29 = vadd.f32 %v659_v27, %v647_v23  ;;  %v664_v30 = vadd.f32 %v655_v26, %v648_v24  ;;  %v665_v31 = vadd.f32 %v659_v27, %v649_v25 }
 0x1a9   : > { %666 = vst [vmem:[#allocation9] sm:$0xff] %v662_v28  ;;  %667 = vst [vmem:[#allocation9 + $0x8] sm:$0xff] %v663_v29 }
 0x1aa   : > { %668 = vst [vmem:[#allocation9 + $0x10] sm:$0xff] %v664_v30  ;;  %669 = vst [vmem:[#allocation9 + $0x18] sm:$0xff] %v665_v31 }
 0x1ab PF: > { %p927_p10 = scmp.eq.s32.totalorder %s1216_s21, 1  ;;  %s1159_s18 = smov [#allocation9]  }
 0x1ac   : > { %s682_s10 = sshll.u32 %s1159_s18, 4  ;;  %s683_s10 = int_to_ptr.vmem [resolvable:$true] %s682_s10 }
 0x1ad   : > { %s1068_s1 = scalar_lea.vmem %s683_s10, 512  ;;  %p1075_p2 = scmp.lt.s32.totalorder %s683_s10, %s683_s10 }
 0x1ae   : > { %p1069_p6 = scmp.ne.s32.totalorder %s683_s10, %s1068_s1  ;;  %p1076_p3 = scmp.lt.s32.totalorder %s1068_s1, %s1068_s1 }
 0x1b0   : > { %p1070_p0 = pnand %p1069_p6, %p927_p10  ;;  %p1077_p4 = por %p1076_p3, %p1075_p2 }
 0x1b2   : > { %p1071_p1 = pneg %p1070_p0 }
 0x1b4   : > { %p1078_p5 = pnand %p1077_p4, %p1071_p1 }
 0x1b6   : > { %1081 = shalt.err (!%p1078_p5)
}
 0x1b7   : > { %s1160_s22 = smov 256   ;;  %s1161_s27 = smov 16  }
 0x1b8   : > { %913 = dma.vmem_to_hbm [thread:$0]  (%p927_p10), %s683_s10, 512, %s1499_s4, [#allocation5], %s1160_s22, %s1160_s22, %s1161_s27  }
 0x1b9   : > { %1125 = dma.done.wait (%p927_p10), [#allocation5], 512  }
 0x1ba   : > { %1127 = vsyncadd (%p927_p10), [#allocation5], 4294966784 }
 0x1bb PF: > { %s21_s20 = sadd.s32 1, %s1150_s20   ;;  %s1518_s18 = sld [smem:[#allocation13_spill]] }
 0x1bc   : > { %p18_p8 = scmp.ge.s32.totalorder %s21_s20, 4   ;;  %s1519_s19 = sld [smem:[#allocation14_spill]] }
 0x1bd   : > { %s1520_s15 = smov %s1134_s16  ;;  %s1521_s16 = smov %s1138_s17 }
 0x1be   : > { %s1522_s17 = smov %s1235_s26  ;;  %20 = sbr.rel (!%p18_p8) target bundleno = 9 (0x9), region = 109 }
 0x1c3   :  { %698 = vsyncpa [#allocation4], 1 }
 0x1c4   :  { %700 = vsyncpa [#allocation4 + $0x1], 1 }
 0x1c5   :  { %701 = vsyncpa [#allocation7], 1 }
 0x1c6   :  { %703 = vsyncpa [#allocation7 + $0x1], 1 }
 0x1c7   :  { %704 = vsyncpa [#allocation5], 1 }
 0x1c8   :  { %706 = vsyncpa [#allocation5 + $0x1], 1 }

</bundles_post_ra>
